<compile_context>
chip_gen: v5e
topology: v5e:2x2
jax: 0.10.0
libtpu: 0.0.40
codegen_flags: <defaults>
</compile_context>

<pallas_src>
import jax
import jax.numpy as jnp
from jax.experimental import pallas as pl
from jax.experimental.pallas import tpu as pltpu

INPUT_SIZE = 64
HIDDEN_SIZE = 128     # lane-aligned (multiple of 128)
BATCH = 2             # single-step batch (padded to 8 rows inside the wrapper)
SEQ_LEN = 8           # timesteps in the fused sequence kernel
SEQ_BATCH = 8         # independent sequences per call (fills the f32 sublane tile)

_VMEM = pl.BlockSpec(memory_space=pltpu.MemorySpace.VMEM)
_PARAMS = pltpu.CompilerParams(vmem_limit_bytes=32 * 1024 * 1024)


# ----------------------------------------------------------------------------
# Single-step RNN cell kernel (exactly RNN.forward).
# ----------------------------------------------------------------------------
def rnn_cell_kernel(x_ref, h_ref, wx_ref, wh_ref, b_ref, out_ref, hid_ref):
    """y = [x ; h] @ [W_i2h | W_i2o] + [b_i2h | b_i2o] -> (hidden, output)."""
    y = (jnp.dot(x_ref[...], wx_ref[...], preferred_element_type=jnp.float32)
         + jnp.dot(h_ref[...], wh_ref[...], preferred_element_type=jnp.float32)
         + b_ref[...])
    hdim = hid_ref.shape[-1]
    hid_ref[...] = y[:, :hdim]          # i2h(combined) -> new hidden
    out_ref[...] = y[:, hdim:]          # i2o(combined) -> output


@jax.jit
def rnn_forward(params, x, h):
    """One RNN.forward step. Batch is padded to a multiple of 8 rows so the
    MXU push / output store use a full f32 sublane tile (unmasked vst)."""
    batch = x.shape[0]
    hdim = params["wh"].shape[0]
    pad_b = (-batch) % 8
    if pad_b:
        x = jnp.pad(x, ((0, pad_b), (0, 0)))
        h = jnp.pad(h, ((0, pad_b), (0, 0)))
    output, hidden = pl.pallas_call(
        rnn_cell_kernel,
        out_shape=(jax.ShapeDtypeStruct((x.shape[0], hdim), jnp.float32),   # output
                   jax.ShapeDtypeStruct((x.shape[0], hdim), jnp.float32)),  # hidden
        in_specs=[_VMEM] * 5,
        out_specs=(_VMEM, _VMEM),
        compiler_params=_PARAMS,
    )(x, h, params["wx"], params["wh"], params["b"])
    return output[:batch], hidden[:batch]


# ----------------------------------------------------------------------------
# Fused sequence kernel: roll the cell over S timesteps (B independent
# sequences) in one pallas_call.
#   * input projection hoisted (one MXU pass over all S*B rows)
#   * serial loop carries ONLY h @ Wh_h (128x128), fully unrolled
#   * i2o projection batched after the loop -> one dense (S*B, H) store
# ----------------------------------------------------------------------------
def rnn_seq_kernel(x_ref, h0_ref, wx_ref, wh_ref, b_ref, out_ref, ht_ref):
    batch = h0_ref.shape[0]                       # B (sublane-tile filled)
    hdim = ht_ref.shape[-1]                       # H
    seq_len = x_ref.shape[0] // batch             # S (static)

    # Hoisted input projection for every (timestep, sequence) row: (S*B, 2H).
    gx = (jnp.dot(x_ref[...], wx_ref[...], preferred_element_type=jnp.float32)
          + b_ref[...])
    wh = wh_ref[...]
    wh_h = wh[:, :hdim]                           # recurrent -> new hidden (H, H)
    wh_o = wh[:, hdim:]                           # recurrent -> output     (H, H)
    gx_h = gx[:, :hdim]                           # lane-aligned 128-splits
    gx_o = gx[:, hdim:]

    # Serial recurrence, fully unrolled at trace time: every slice below is a
    # static, tile-aligned (8,128) access. Only h @ wh_h is on the critical
    # path; the incoming hiddens are stashed for the batched i2o pass.
    h = h0_ref[...]                               # (B, H)
    hs = []
    for t in range(seq_len):
        hs.append(h)                              # incoming h_t
        h = gx_h[t * batch:(t + 1) * batch, :] + jnp.dot(
            h, wh_h, preferred_element_type=jnp.float32)
    ht_ref[...] = h                               # final hidden

    # Batched output projection over all timesteps: one (S*B, H) @ (H, H)
    # matmul and a single dense, unmasked store.
    h_all = jnp.concatenate(hs, axis=0)           # (S*B, H), time-major
    out_ref[...] = gx_o + jnp.dot(h_all, wh_o, preferred_element_type=jnp.float32)


@jax.jit
def rnn_sequence(params, x_seq):
    """x_seq: (S, B, I) time-major batch of B independent sequences.
    Returns (outputs (S, B, H), final hidden (B, H))."""
    seq_len, batch, in_dim = x_seq.shape
    hdim = params["wh"].shape[0]
    x_flat = x_seq.reshape(seq_len * batch, in_dim)     # time-major rows
    h0 = jnp.zeros((batch, hdim), jnp.float32)          # initHidden() per sequence
    outs_flat, h_final = pl.pallas_call(
        rnn_seq_kernel,
        out_shape=(jax.ShapeDtypeStruct((seq_len * batch, hdim), jnp.float32),
                   jax.ShapeDtypeStruct((batch, hdim), jnp.float32)),
        in_specs=[_VMEM] * 5,
        out_specs=(_VMEM, _VMEM),
        compiler_params=_PARAMS,
    )(x_flat, h0, params["wx"], params["wh"], params["b"])
    return outs_flat.reshape(seq_len, batch, hdim), h_final


# ----------------------------------------------------------------------------
# Parameters (deterministic, PyTorch-style uniform init for nn.Linear).
# ----------------------------------------------------------------------------
def make_params(key, input_size, hidden_size):
    k1, k2, k3, k4 = jax.random.split(key, 4)
    fan_in = input_size + hidden_size
    bound = 1.0 / jnp.sqrt(jnp.float32(fan_in))
    # Pre-transposed layout: (fan_in, hidden) so kernels compute x @ W.
    w_i2h = jax.random.uniform(k1, (fan_in, hidden_size), jnp.float32, -bound, bound)
    w_i2o = jax.random.uniform(k2, (fan_in, hidden_size), jnp.float32, -bound, bound)
    b_i2h = jax.random.uniform(k3, (1, hidden_size), jnp.float32, -bound, bound)
    b_i2o = jax.random.uniform(k4, (1, hidden_size), jnp.float32, -bound, bound)
    # Fuse i2h | i2o column-wise; split rows into input / hidden halves
    # (this is the folded torch.cat).
    w_cat = jnp.concatenate([w_i2h, w_i2o], axis=1)        # (fan_in, 2H)
    return {
        "wx": w_cat[:input_size, :],                       # multiplies input
        "wh": w_cat[input_size:, :],                       # multiplies hidden
        "b": jnp.concatenate([b_i2h, b_i2o], axis=1),      # (1, 2H)
        # unfused copies kept only for the pure-JAX reference check
        "w_i2h": w_i2h, "w_i2o": w_i2o, "b_i2h": b_i2h, "b_i2o": b_i2o,
    }


def rnn_reference(params, x, h):
    """Pure-JAX reference matching RNN.forward numerics."""
    combined = jnp.concatenate([x, h], axis=1)
    hidden = combined @ params["w_i2h"] + params["b_i2h"]
    output = combined @ params["w_i2o"] + params["b_i2o"]
    return output, hidden


if __name__ == "__main__":
    key = jax.random.PRNGKey(0)
    kp, kx, ks = jax.random.split(key, 3)
    params = make_params(kp, INPUT_SIZE, HIDDEN_SIZE)

    # --- single-step forward (matches RNN.forward) ---
    x = jax.random.normal(kx, (BATCH, INPUT_SIZE), jnp.float32)
    h0 = jnp.zeros((BATCH, HIDDEN_SIZE), jnp.float32)      # initHidden() per row
    out, hid = jax.block_until_ready(rnn_forward(params, x, h0))
    ref_out, ref_hid = rnn_reference(params, x, h0)
    assert out.shape == (BATCH, HIDDEN_SIZE) and hid.shape == (BATCH, HIDDEN_SIZE)
    assert bool(jnp.all(jnp.isfinite(out))) and bool(jnp.all(jnp.isfinite(hid)))
    assert bool(jnp.allclose(out, ref_out, atol=1e-5, rtol=1e-5))
    assert bool(jnp.allclose(hid, ref_hid, atol=1e-5, rtol=1e-5))

    # --- fused recurrence over SEQ_BATCH independent sequences of length S ---
    xs = jax.random.normal(ks, (SEQ_LEN, SEQ_BATCH, INPUT_SIZE), jnp.float32)
    outs, h_final = jax.block_until_ready(rnn_sequence(params, xs))
    assert outs.shape == (SEQ_LEN, SEQ_BATCH, HIDDEN_SIZE)
    assert h_final.shape == (SEQ_BATCH, HIDDEN_SIZE)
    h_ref = jnp.zeros((SEQ_BATCH, HIDDEN_SIZE), jnp.float32)
    ref_rows = []
    for t in range(SEQ_LEN):
        o_t, h_ref = rnn_reference(params, xs[t], h_ref)
        ref_rows.append(o_t)
    ref_outs = jnp.stack(ref_rows, axis=0)
    assert bool(jnp.allclose(outs, ref_outs, atol=1e-4, rtol=1e-4))
    assert bool(jnp.allclose(h_final, h_ref, atol=1e-4, rtol=1e-4))

    print("KERNEL_OK")
</pallas_src>

<mosaic_0001>
module attributes {stable_mosaic.version = 11 : i64} {
  func.func @rnn_cell_kernel(%arg0: memref<8x64xf32, #tpu.memory_space<vmem>>, %arg1: memref<8x128xf32, #tpu.memory_space<vmem>>, %arg2: memref<64x256xf32, #tpu.memory_space<vmem>>, %arg3: memref<128x256xf32, #tpu.memory_space<vmem>>, %arg4: memref<1x256xf32, #tpu.memory_space<vmem>>, %arg5: memref<8x128xf32, #tpu.memory_space<vmem>>, %arg6: memref<8x128xf32, #tpu.memory_space<vmem>>) attributes {dimension_semantics = [], scalar_prefetch = 0 : i64, scratch_operands = 0 : i64, tpu.core_type = #tpu.core_type<tc>} {
    %c0 = arith.constant 0 : index
    %c0_0 = arith.constant 0 : index
    %0 = vector.load %arg0[%c0, %c0_0] : memref<8x64xf32, #tpu.memory_space<vmem>>, vector<8x64xf32>
    %c0_1 = arith.constant 0 : index
    %c0_2 = arith.constant 0 : index
    %1 = vector.load %arg2[%c0_1, %c0_2] : memref<64x256xf32, #tpu.memory_space<vmem>>, vector<64x256xf32>
    %cst = arith.constant dense<0.000000e+00> : vector<8x256xf32>
    %2 = tpu.matmul %0, %1, %cst {dimension_numbers = #tpu.dot_dimension_numbers<[1], [0], [0], [1], [0, 0, 1, 1], [], []>} : vector<8x64xf32>, vector<64x256xf32>, vector<8x256xf32> -> vector<8x256xf32>
    %c0_3 = arith.constant 0 : index
    %c0_4 = arith.constant 0 : index
    %3 = vector.load %arg1[%c0_3, %c0_4] : memref<8x128xf32, #tpu.memory_space<vmem>>, vector<8x128xf32>
    %c0_5 = arith.constant 0 : index
    %c0_6 = arith.constant 0 : index
    %4 = vector.load %arg3[%c0_5, %c0_6] : memref<128x256xf32, #tpu.memory_space<vmem>>, vector<128x256xf32>
    %cst_7 = arith.constant dense<0.000000e+00> : vector<8x256xf32>
    %5 = tpu.matmul %3, %4, %cst_7 {dimension_numbers = #tpu.dot_dimension_numbers<[1], [0], [0], [1], [0, 0, 1, 1], [], []>} : vector<8x128xf32>, vector<128x256xf32>, vector<8x256xf32> -> vector<8x256xf32>
    %6 = arith.addf %2, %5 : vector<8x256xf32>
    %c0_8 = arith.constant 0 : index
    %c0_9 = arith.constant 0 : index
    %7 = vector.load %arg4[%c0_8, %c0_9] : memref<1x256xf32, #tpu.memory_space<vmem>>, vector<1x256xf32>
    %8 = vector.broadcast %7 : vector<1x256xf32> to vector<8x256xf32>
    %9 = arith.addf %6, %8 : vector<8x256xf32>
    %10 = vector.extract_strided_slice %9 {offsets = [0, 0], sizes = [8, 128], strides = [1, 1]} : vector<8x256xf32> to vector<8x128xf32>
    %c0_10 = arith.constant 0 : index
    %c0_11 = arith.constant 0 : index
    %11 = vector.load %arg6[%c0_10, %c0_11] : memref<8x128xf32, #tpu.memory_space<vmem>>, vector<8x128xf32>
    tpu.vector_store %arg6[%c0_10, %c0_11], %10 {strides = array<i32>} : memref<8x128xf32, #tpu.memory_space<vmem>>, vector<8x128xf32>,
    %12 = vector.extract_strided_slice %9 {offsets = [0, 128], sizes = [8, 128], strides = [1, 1]} : vector<8x256xf32> to vector<8x128xf32>
    %c0_12 = arith.constant 0 : index
    %c0_13 = arith.constant 0 : index
    %13 = vector.load %arg5[%c0_12, %c0_13] : memref<8x128xf32, #tpu.memory_space<vmem>>, vector<8x128xf32>
    tpu.vector_store %arg5[%c0_12, %c0_13], %12 {strides = array<i32>} : memref<8x128xf32, #tpu.memory_space<vmem>>, vector<8x128xf32>,
    return
  }
}

</mosaic_0001>

<bundles_post_ra>
// kernel: rnn_forward.1
= control target key start
LH: loop header
LB: loop body
LE: loop exit
PB: predicated region body
PF: predicated region fallthrough
CT: control target
= control target key end

     0   :  { %12 = vsyncpa [#allocation3], 0  ;;  %s326_s0 = inlined_call_operand.vmem [shape: f32[8,64], index: 0, kind: input, shape index: {}]   ;;  %s327_s1 = inlined_call_operand.vmem [shape: f32[8,128], index: 1, kind: input, shape index: {}]   ;;  %s328_s2 = inlined_call_operand.hbm [shape: f32[64,256], index: 2, kind: input, shape index: {}]   ;;  %s329_s3 = inlined_call_operand.hbm [shape: f32[128,256], index: 3, kind: input, shape index: {}]   ;;  %s330_s4 = inlined_call_operand.vmem [shape: f32[1,256], index: 4, kind: input, shape index: {}]   ;;  %s331_s5 = inlined_call_operand.vmem [shape: f32[8,128], index: 5, kind: output, shape index: {0}]   ;;  %s332_s6 = inlined_call_operand.vmem [shape: f32[8,128], index: 6, kind: output, shape index: {1}]  }
   0x1   :  { %s22_s23 = sshll.u32 %s328_s2, 4  ;;  %s23_s23 = int_to_ptr.hbm [resolvable:$true] %s22_s23 }
   0x2   :  { %13 = vsyncpa [#allocation5], 0  ;;  %s266_s24 = smov [#allocation2]   ;;  %s35_s28 = sshll.u32 %s329_s3, 4  ;;  %s36_s28 = int_to_ptr.hbm [resolvable:$true] %s35_s28 }
   0x3   :  { %s24_s25 = sshll.u32 %s266_s24, 4  ;;  %s267_s29 = smov 256   ;;  %s25_s25 = int_to_ptr.vmem [resolvable:$true] %s24_s25 }
   0x4   :  { %s268_s30 = smov 16   ;;  %s269_s7 = smov [#allocation4]  }
   0x5   :  { %30 = dma.hbm_to_vmem [thread:$0]  %s23_s23, 2048, %s25_s25, [#allocation3], %s267_s29, %s267_s29, %s268_s30  }
   0x6   :  { %s37_s8 = sshll.u32 %s269_s7, 4  ;;  %s38_s8 = int_to_ptr.vmem [resolvable:$true] %s37_s8 }
   0x7   :  { %43 = dma.hbm_to_vmem [thread:$0]  %s36_s28, 4096, %s38_s8, [#allocation5], %s267_s29, %s267_s29, %s268_s30  }
   0x8   :  { %262 = dma.done.wait [#allocation3], 2048  }
   0x9   :  { %263 = vsyncadd [#allocation3], 4294965248 }
   0xa   :  { %264 = dma.done.wait [#allocation5], 4096  }
   0xb   :  { %265 = vsyncadd [#allocation5], 4294963200  ;;  %v102_v0 = vld [vmem:[#allocation4 + $0xf0] sm:$0xff]  ;;  %v103_v1 = vld [vmem:[#allocation4 + $0xf8] sm:$0xff]  ;;  %vm144_vm0 = vcmask 523264  }
   0xc   :  { %v100_v2 = vld [vmem:[#allocation4 + $0xe0] sm:$0xff]  ;;  %104 = vmatpush.msra.mxu0 %v102_v0  ;;  %124 = vmatpush.msra.mxu1 %v103_v1  ;;  %v101_v3 = vld [vmem:[#allocation4 + $0xe8] sm:$0xff]  ;;  %v98_v4 = vld [vmem:[#allocation4 + $0xd0] sm:$0xff] }
   0xd   :  { %v99_v5 = vld [vmem:[#allocation4 + $0xd8] sm:$0xff]  ;;  %v96_v6 = vld [vmem:[#allocation4 + $0xc0] sm:$0xff]  ;;  %v97_v7 = vld [vmem:[#allocation4 + $0xc8] sm:$0xff] }
   0xe   :  { %105 = vmatpush.msra.mxu0 %v100_v2  ;;  %125 = vmatpush.msra.mxu1 %v101_v3  ;;  %v69_v8 = vld [vmem:[#allocation2 + $0x70] sm:$0xff]  ;;  %v70_v9 = vld [vmem:[#allocation2 + $0x78] sm:$0xff]  ;;  %v67_v10 = vld [vmem:[#allocation2 + $0x60] sm:$0xff] }
   0xf   :  { %v68_v11 = vld [vmem:[#allocation2 + $0x68] sm:$0xff]  ;;  %v94_v12 = vld [vmem:[#allocation4 + $0xb0] sm:$0xff]  ;;  %v95_v13 = vld [vmem:[#allocation4 + $0xb8] sm:$0xff]  ;;  %156 = vmatpush.msra.mxu2 %v69_v8  ;;  %176 = vmatpush.msra.mxu3 %v70_v9 }
  0x10   :  { %106 = vmatpush.msra.mxu0 %v98_v4  ;;  %126 = vmatpush.msra.mxu1 %v99_v5  ;;  %v65_v14 = vld [vmem:[#allocation2 + $0x50] sm:$0xff]  ;;  %v66_v15 = vld [vmem:[#allocation2 + $0x58] sm:$0xff]  ;;  %v92_v16 = vld [vmem:[#allocation4 + $0xa0] sm:$0xff] }
  0x11   :  { %v93_v17 = vld [vmem:[#allocation4 + $0xa8] sm:$0xff]  ;;  %157 = vmatpush.msra.mxu2 %v67_v10  ;;  %177 = vmatpush.msra.mxu3 %v68_v11  ;;  %v63_v18 = vld [vmem:[#allocation2 + $0x40] sm:$0xff]  ;;  %v90_v20 = vld [vmem:[#allocation4 + $0x90] sm:$0xff] }
  0x12   :  { %107 = vmatpush.msra.mxu0 %v96_v6  ;;  %127 = vmatpush.msra.mxu1 %v97_v7  ;;  %v64_v19 = vld [vmem:[#allocation2 + $0x48] sm:$0xff]  ;;  %v91_v21 = vld [vmem:[#allocation4 + $0x98] sm:$0xff]  ;;  %v61_v22 = vld [vmem:[#allocation2 + $0x30] sm:$0xff] }
  0x13   :  { %158 = vmatpush.msra.mxu2 %v65_v14  ;;  %178 = vmatpush.msra.mxu3 %v66_v15  ;;  %v62_v23 = vld [vmem:[#allocation2 + $0x38] sm:$0xff]  ;;  %v88_v24 = vld [vmem:[#allocation4 + $0x80] sm:$0xff]  ;;  %v89_v25 = vld [vmem:[#allocation4 + $0x88] sm:$0xff] }
  0x14   :  { %108 = vmatpush.msra.mxu0 %v94_v12  ;;  %128 = vmatpush.msra.mxu1 %v95_v13  ;;  %v59_v26 = vld [vmem:[#allocation2 + $0x20] sm:$0xff]  ;;  %v60_v27 = vld [vmem:[#allocation2 + $0x28] sm:$0xff]  ;;  %v86_v28 = vld [vmem:[#allocation4 + $0x70] sm:$0xff] }
  0x15   :  { %159 = vmatpush.msra.mxu2 %v63_v18  ;;  %179 = vmatpush.msra.mxu3 %v64_v19  ;;  %v87_v29 = vld [vmem:[#allocation4 + $0x78] sm:$0xff]  ;;  %v57_v30 = vld [vmem:[#allocation2 + $0x10] sm:$0xff]  ;;  %v84_v32 = vld [vmem:[#allocation4 + $0x60] sm:$0xff] }
  0x16   :  { %109 = vmatpush.msra.mxu0 %v92_v16  ;;  %129 = vmatpush.msra.mxu1 %v93_v17  ;;  %v58_v31 = vld [vmem:[#allocation2 + $0x18] sm:$0xff]  ;;  %v85_v33 = vld [vmem:[#allocation4 + $0x68] sm:$0xff]  ;;  %v55_v34 = vld [vmem:[#allocation2] sm:$0xff] }
  0x17   :  { %160 = vmatpush.msra.mxu2 %v61_v22  ;;  %180 = vmatpush.msra.mxu3 %v62_v23  ;;  %v56_v35 = vld [vmem:[#allocation2 + $0x8] sm:$0xff]  ;;  %v82_v36 = vld [vmem:[#allocation4 + $0x50] sm:$0xff]  ;;  %v83_v37 = vld [vmem:[#allocation4 + $0x58] sm:$0xff] }
  0x18   :  { %110 = vmatpush.msra.mxu0 %v90_v20  ;;  %130 = vmatpush.msra.mxu1 %v91_v21  ;;  %v54_v38 = vld [vmem:[%s326_s0] sm:$0xff]  ;;  %v81_v40 = vld [vmem:[#allocation4 + $0x48] sm:$0xff]  ;;  %v78_v41 = vld [vmem:[#allocation4 + $0x30] sm:$0xff] }
  0x19   :  { %161 = vmatpush.msra.mxu2 %v59_v26  ;;  %181 = vmatpush.msra.mxu3 %v60_v27  ;;  %v80_v39 = vld [vmem:[#allocation4 + $0x40] sm:$0xff]  ;;  %v79_v42 = vld [vmem:[#allocation4 + $0x38] sm:$0xff]  ;;  %v77_v44 = vld [vmem:[#allocation4 + $0x28] sm:$0xff] }
  0x1a   :  { %111 = vmatpush.msra.mxu0 %v88_v24  ;;  %131 = vmatpush.msra.mxu1 %v89_v25  ;;  %v76_v43 = vld [vmem:[#allocation4 + $0x20] sm:$0xff]  ;;  %v74_v45 = vld [vmem:[#allocation4 + $0x10] sm:$0xff]  ;;  %v75_v46 = vld [vmem:[#allocation4 + $0x18] sm:$0xff] }
  0x1b   :  { %162 = vmatpush.msra.mxu2 %v57_v30  ;;  %182 = vmatpush.msra.mxu3 %v58_v31  ;;  %v72_v47 = vld [vmem:[#allocation4] sm:$0xff]  ;;  %v73_v48 = vld [vmem:[#allocation4 + $0x8] sm:$0xff] }
  0x1c   :  { %112 = vmatpush.msra.mxu0 %v86_v28  ;;  %132 = vmatpush.msra.mxu1 %v87_v29  ;;  %v71_v49 = vld [vmem:[%s327_s1] sm:$0xff] }
  0x1d   :  { %163 = vmatpush.msra.mxu2 %v55_v34  ;;  %183 = vmatpush.msra.mxu3 %v56_v35  ;;  %v188_v50 = vld [vmem:[%s330_s4] sm:$0x3] }
  0x1e   :  { %113 = vmatpush.msra.mxu0 %v84_v32  ;;  %133 = vmatpush.msra.mxu1 %v85_v33  ;;  %v190_v53 = vperm.slane %v188_v50, 0  ;;  %v191_v54 = vperm.slane %v188_v50, 1 }
  0x1f   :  { %208 = vmatmul.msk.f32.vlgmr.msra.gmra.mxu2 %vm144_vm0, %v54_v38  ;;  %209 = vmatmul.msk.f32.vlgmr.msra.gmra.mxu3 %vm144_vm0, %v54_v38 }
  0x20   :  { %114 = vmatpush.msra.mxu0 %v82_v36  ;;  %134 = vmatpush.msra.mxu1 %v83_v37 }
  0x22   :  { %115 = vmatpush.msra.mxu0 %v80_v39  ;;  %135 = vmatpush.msra.mxu1 %v81_v40 }
  0x24   :  { %116 = vmatpush.msra.mxu0 %v78_v41  ;;  %136 = vmatpush.msra.mxu1 %v79_v42 }
  0x26   :  { %117 = vmatpush.msra.mxu0 %v76_v43  ;;  %137 = vmatpush.msra.mxu1 %v77_v44 }
  0x28   :  { %118 = vmatpush.msra.mxu0 %v74_v45  ;;  %138 = vmatpush.msra.mxu1 %v75_v46 }
  0x2a   :  { %119 = vmatpush.msra.mxu0 %v72_v47  ;;  %139 = vmatpush.msra.mxu1 %v73_v48 }
  0x2b   :  { %120 = vmatmul.f32.vlgmr.msra.gmra.mxu0 %v71_v49  ;;  %140 = vmatmul.f32.vlgmr.msra.gmra.mxu1 %v71_v49 }
  0xa2   :  { %v165_v51 = vpop.f32.mrf.mxu2  ;;  %v185_v52 = vpop.f32.mrf.mxu3 }
  0xa8   :  { %v121_v55 = vpop.f32.mrf.mxu0  ;;  %v141_v56 = vpop.f32.mrf.mxu1 }
  0xa9   :  { %v166_v57 = vadd.f32 %v165_v51, %v121_v55  ;;  %v186_v58 = vadd.f32 %v185_v52, %v141_v56 }
  0xab   :  { %v194_v59 = vadd.f32 %v190_v53, %v166_v57  ;;  %v195_v60 = vadd.f32 %v191_v54, %v186_v58 }
  0xad   :  { %196 = vst [vmem:[%s332_s6] sm:$0xff] %v194_v59 }
  0xae   :  { %197 = vst [vmem:[%s331_s5] sm:$0xff] %v195_v60 }
  0xaf   :  { %206 = vsyncpa [#allocation3], 1 }
  0xb0   :  { %207 = vsyncpa [#allocation5], 1 }

</bundles_post_ra>
